<compile_context>
chip_gen: v5e
topology: v5e:2x2
jax: 0.10.0
libtpu: 0.0.40
codegen_flags: <defaults>
</compile_context>

<pallas_src>
import numpy as np
import jax
import jax.numpy as jnp
from jax import lax
from jax.experimental import pallas as pl
from jax.experimental.pallas import tpu as pltpu

LANES = 128     # lanes per vreg
SUBR = 8        # f32 sublane rows per vreg (innermost unrolled piece)
GRP = 32        # rows per fori_loop iteration (int8 tile = (32, 128))
NSLOT = 13      # 1 running-max slot + 2 classes * 6 sums
EPS = 1e-4


def _round_up(x, m):
    return ((x + m - 1) // m) * m


def _dice_sums_kernel(p1_ref, p2_ref, reg_ref, edge_ref, out_ref):
    # p1_ref, p2_ref : (1, 1, TR, 128)  logit channels 1 and 2 (input dtype)
    # reg_ref        : (1, TR, 128)     int8 regular label
    # edge_ref       : (1, TR, 128)     int8 edge label, already in {0, 1}
    # out_ref        : (1, NSLOT, 8, 128) f32, resident across the chunk axis
    c = pl.program_id(1)

    @pl.when(c == 0)
    def _init():
        out_ref[...] = jnp.zeros_like(out_ref)

    tr = reg_ref.shape[1]                       # static block rows
    accs = tuple(out_ref[0, j] for j in range(NSLOT))   # 13 x (8, 128) f32

    def body(t, accs):
        (mx,
         s10, s11, s12, s13, s14, s15,
         s20, s21, s22, s23, s24, s25) = accs
        off = pl.multiple_of(t * GRP, GRP)
        # One int8 vreg per label plane, 4 f32 vregs per logit plane per group.
        p1g = p1_ref[0, 0, pl.ds(off, GRP), :].astype(jnp.float32)   # (GRP,128)
        p2g = p2_ref[0, 0, pl.ds(off, GRP), :].astype(jnp.float32)
        regg = reg_ref[0, pl.ds(off, GRP), :].astype(jnp.float32)
        edgg = edge_ref[0, pl.ds(off, GRP), :].astype(jnp.float32)
        for k in range(GRP // SUBR):            # static unroll, vreg-sized slices
            sl = slice(k * SUBR, (k + 1) * SUBR)
            p1 = p1g[sl]
            p2 = p2g[sl]
            regf = regg[sl]
            edgef = edgg[sl]
            lab1 = (regf == 1.0).astype(jnp.float32)   # exact: small ints
            lab2 = (regf == 2.0).astype(jnp.float32)
            mx = jnp.maximum(mx, regf)
            lp1 = lab1 * p1
            lp2 = lab2 * p2
            s10 += lp1
            s11 += p1
            s12 += lab1
            s13 += lp1 * edgef
            s14 += p1 * edgef
            s15 += lab1 * edgef
            s20 += lp2
            s21 += p2
            s22 += lab2
            s23 += lp2 * edgef
            s24 += p2 * edgef
            s25 += lab2 * edgef
        return (mx, s10, s11, s12, s13, s14, s15,
                s20, s21, s22, s23, s24, s25)

    accs = lax.fori_loop(0, tr // GRP, body, accs, unroll=2)
    for j in range(NSLOT):
        out_ref[0, j] = accs[j]


def edge_organ_seg_dice_loss(logit, label, lamda=1.0, max_tile_rows=2048):
    B, C, Z, Y, X = logit.shape
    assert C == 3
    assert label.shape == (B, 2, Z, Y, X)
    V = Z * Y * X

    S128 = -(-V // LANES)                                   # ceil(V / 128)
    tr_cap = _round_up(max(int(max_tile_rows), GRP), GRP)
    TR = min(tr_cap, _round_up(max(S128, 1), GRP))          # multiple of 32
    S = _round_up(S128, TR)
    nchunks = S // TR
    V_pad = S * LANES

    # Labels -> int8 (edge pre-binarized). Logits keep their incoming dtype;
    # the cast to f32 happens per-tile inside the kernel.
    reg_i8 = label[:, 0].reshape(B, V).astype(jnp.int8)
    edge_i8 = (label[:, 1].reshape(B, V) > 0).astype(jnp.int8)
    logit_f = logit.reshape(B, C, V)

    if V_pad != V:
        # Exact zero padding (adds 0 to every sum, does not change max(label)).
        # TODO(synk): mask the ragged tail in-kernel instead of materializing pads.
        pw = V_pad - V
        reg_i8 = jnp.pad(reg_i8, ((0, 0), (0, pw)))
        edge_i8 = jnp.pad(edge_i8, ((0, 0), (0, pw)))
        logit_f = jnp.pad(logit_f, ((0, 0), (0, 0), (0, pw)))

    reg_i8 = reg_i8.reshape(B, S, LANES)
    edge_i8 = edge_i8.reshape(B, S, LANES)
    logit_f = logit_f.reshape(B, C, S, LANES)

    parts = pl.pallas_call(
        _dice_sums_kernel,
        out_shape=jax.ShapeDtypeStruct((B, NSLOT, SUBR, LANES), jnp.float32),
        grid=(B, nchunks),
        in_specs=[
            # Same array twice; channel 0 is never DMA'd.
            pl.BlockSpec((1, 1, TR, LANES), lambda b, c: (b, 1, c, 0)),
            pl.BlockSpec((1, 1, TR, LANES), lambda b, c: (b, 2, c, 0)),
            pl.BlockSpec((1, TR, LANES), lambda b, c: (b, c, 0)),
            pl.BlockSpec((1, TR, LANES), lambda b, c: (b, c, 0)),
        ],
        out_specs=pl.BlockSpec((1, NSLOT, SUBR, LANES),
                               lambda b, c: (b, 0, 0, 0)),
        compiler_params=pltpu.CompilerParams(
            dimension_semantics=("parallel", "arbitrary")),
    )(logit_f, logit_f, reg_i8, edge_i8)

    # ---- final (tiny) reductions + data-dependent dice combine in JAX glue ----
    maxlab = jnp.max(parts[:, 0], axis=(1, 2))              # (B,)
    s = jnp.sum(parts[:, 1:], axis=(2, 3))                  # (B, 12)
    nc = jnp.round(maxlab).astype(jnp.int32) + 1            # num_classes / sample

    def dice(lp, p, l):
        return (2.0 * lp + EPS) / (p + l)

    d1 = dice(s[:, 0], s[:, 1], s[:, 2])                    # class 1, regular
    e1 = dice(s[:, 3], s[:, 4], s[:, 5])                    # class 1, edge
    d2 = dice(s[:, 6], s[:, 7], s[:, 8])                    # class 2, regular
    e2 = dice(s[:, 9], s[:, 10], s[:, 11])                  # class 2, edge

    m1 = nc >= 2
    m2 = nc >= 3
    # where-guard: excluded classes can have 0/0 or x/0 terms; never let them
    # contribute (avoids 0*inf = NaN).
    d1 = jnp.where(m1, d1, 0.0)
    e1 = jnp.where(m1, e1, 0.0)
    d2 = jnp.where(m2, d2, 0.0)
    e2 = jnp.where(m2, e2, 0.0)
    denom = jnp.maximum(nc - 1, 1).astype(jnp.float32)      # == nc when nc == 1

    final_loss = -jnp.sum((d1 + d2) / denom) / B
    final_edge_loss = -jnp.sum((e1 + e2) / denom) / B
    total = final_loss + lamda * final_edge_loss
    return total, [lax.stop_gradient(total)]


def _reference_numpy(logit, label, lamda=1.0):
    # Mirrors the PyTorch module exactly (numpy).
    B = logit.shape[0]
    reg = label[:, 0]
    edge = label[:, 1]
    final_loss = 0.0
    final_edge = 0.0
    for bs in range(B):
        nc = int(round(float(reg[bs].max()))) + 1
        bs_loss = 0.0
        bs_edge = 0.0
        e = (edge[bs] > 0).astype(np.float32)
        for i in range(1, nc):
            prob = logit[bs, i].astype(np.float32)
            lab = (reg[bs] == i).astype(np.float32)
            bs_loss += (2.0 * np.sum(lab * prob) + 1e-4) / (np.sum(prob) + np.sum(lab))
            bs_edge += (2.0 * np.sum(lab * prob * e) + 1e-4) / (
                np.sum(prob * e) + np.sum(lab * e))
        d = (nc - 1) if nc > 1 else nc
        final_loss += bs_loss / d
        final_edge += bs_edge / d
    final_loss = -final_loss / B
    final_edge = -final_edge / B
    return final_loss + lamda * final_edge


if __name__ == "__main__":
    key = jax.random.PRNGKey(0)
    B, C, Z, Y, X = 2, 3, 8, 16, 64          # V = 8192 voxels (no padding needed)
    k1, k2, k3 = jax.random.split(key, 3)

    logit = jax.random.uniform(k1, (B, C, Z, Y, X), dtype=jnp.float32)
    # sample 0: organ-seg case (labels in {0,1,2}); sample 1: liver case ({0,1})
    reg0 = jax.random.randint(k2, (1, Z, Y, X), 0, 3)
    reg1 = jax.random.randint(jax.random.fold_in(k2, 1), (1, Z, Y, X), 0, 2)
    reg = jnp.concatenate([reg0, reg1], axis=0).astype(jnp.float32)
    edge = jax.random.randint(k3, (B, Z, Y, X), 0, 2).astype(jnp.float32)
    label = jnp.stack([reg, edge], axis=1)    # (B, 2, Z, Y, X)

    ref = _reference_numpy(np.asarray(logit), np.asarray(label))

    # 1) default tiling: single chunk, multi-iteration inner accumulation loop
    loss1, _ = edge_organ_seg_dice_loss(logit, label)
    loss1 = jax.block_until_ready(loss1)
    assert np.allclose(float(loss1), ref, rtol=1e-4, atol=1e-5), (float(loss1), ref)

    # 2) small tile cap: exercises multi-chunk accumulation across the grid
    loss2, _ = edge_organ_seg_dice_loss(logit, label, max_tile_rows=32)
    loss2 = jax.block_until_ready(loss2)
    assert np.allclose(float(loss2), ref, rtol=1e-4, atol=1e-5), (float(loss2), ref)

    # 3) ragged volume: exercises the zero-padding fallback path
    Z3, Y3, X3 = 5, 6, 7
    logit3 = jax.random.uniform(jax.random.fold_in(k1, 3), (B, C, Z3, Y3, X3),
                                dtype=jnp.float32)
    reg3 = jax.random.randint(jax.random.fold_in(k2, 3), (B, Z3, Y3, X3), 0, 3)
    edge3 = jax.random.randint(jax.random.fold_in(k3, 3), (B, Z3, Y3, X3), 0, 2)
    label3 = jnp.stack([reg3.astype(jnp.float32), edge3.astype(jnp.float32)], axis=1)
    ref3 = _reference_numpy(np.asarray(logit3), np.asarray(label3))
    loss3, _ = edge_organ_seg_dice_loss(logit3, label3)
    loss3 = jax.block_until_ready(loss3)
    assert np.allclose(float(loss3), ref3, rtol=1e-4, atol=1e-5), (float(loss3), ref3)

    print("KERNEL_OK")
</pallas_src>

<mosaic_0001>
module attributes {stable_mosaic.version = 11 : i64} {
  func.func @_dice_sums_kernel(%arg0: i32, %arg1: i32, %arg2: memref<1x1x64x128xf32, #tpu.memory_space<vmem>>, %arg3: memref<1x1x64x128xf32, #tpu.memory_space<vmem>>, %arg4: memref<1x64x128xi8, #tpu.memory_space<vmem>>, %arg5: memref<1x64x128xi8, #tpu.memory_space<vmem>>, %arg6: memref<1x13x8x128xf32, #tpu.memory_space<vmem>>) attributes {dimension_semantics = [#tpu.dimension_semantics<parallel>, #tpu.dimension_semantics<arbitrary>], iteration_bounds = array<i64: 2, 1>, scalar_prefetch = 0 : i64, scratch_operands = 0 : i64, tpu.core_type = #tpu.core_type<tc>, window_params = [{transform_indices = @transform_0, window_bounds = array<i64: 1, 1, 64, 128>}, {transform_indices = @transform_1, window_bounds = array<i64: 1, 1, 64, 128>}, {transform_indices = @transform_2, window_bounds = array<i64: 1, 64, 128>}, {transform_indices = @transform_3, window_bounds = array<i64: 1, 64, 128>}, {transform_indices = @transform_4, window_bounds = array<i64: 1, 13, 8, 128>}]} {
    %c0_i32 = arith.constant 0 : i32
    %0 = arith.cmpi eq, %arg1, %c0_i32 : i32
    %1 = arith.extui %0 : i1 to i32
    %c0_i32_0 = arith.constant 0 : i32
    %2 = arith.cmpi ne, %1, %c0_i32_0 : i32
    scf.if %2 {
      %cst_129 = arith.constant 0.000000e+00 : f32
      %364 = vector.broadcast %cst_129 : f32 to vector<1x13x8x128xf32>
      %c0_130 = arith.constant 0 : index
      %c0_131 = arith.constant 0 : index
      %c0_132 = arith.constant 0 : index
      %c0_133 = arith.constant 0 : index
      %365 = vector.load %arg6[%c0_130, %c0_131, %c0_132, %c0_133] : memref<1x13x8x128xf32, #tpu.memory_space<vmem>>, vector<1x13x8x128xf32>
      tpu.vector_store %arg6[%c0_130, %c0_131, %c0_132, %c0_133], %364 {strides = array<i32>} : memref<1x13x8x128xf32, #tpu.memory_space<vmem>>, vector<1x13x8x128xf32>,
    } else {
    }
    %c0 = arith.constant 0 : index
    %c0_1 = arith.constant 0 : index
    %c0_2 = arith.constant 0 : index
    %c0_3 = arith.constant 0 : index
    %3 = vector.load %arg6[%c0, %c0_1, %c0_2, %c0_3] : memref<1x13x8x128xf32, #tpu.memory_space<vmem>>, vector<1x1x8x128xf32>
    %4 = vector.shape_cast %3 : vector<1x1x8x128xf32> to vector<8x128xf32>
    %c0_4 = arith.constant 0 : index
    %c1 = arith.constant 1 : index
    %c0_5 = arith.constant 0 : index
    %c0_6 = arith.constant 0 : index
    %5 = vector.load %arg6[%c0_4, %c1, %c0_5, %c0_6] : memref<1x13x8x128xf32, #tpu.memory_space<vmem>>, vector<1x1x8x128xf32>
    %6 = vector.shape_cast %5 : vector<1x1x8x128xf32> to vector<8x128xf32>
    %c0_7 = arith.constant 0 : index
    %c2 = arith.constant 2 : index
    %c0_8 = arith.constant 0 : index
    %c0_9 = arith.constant 0 : index
    %7 = vector.load %arg6[%c0_7, %c2, %c0_8, %c0_9] : memref<1x13x8x128xf32, #tpu.memory_space<vmem>>, vector<1x1x8x128xf32>
    %8 = vector.shape_cast %7 : vector<1x1x8x128xf32> to vector<8x128xf32>
    %c0_10 = arith.constant 0 : index
    %c3 = arith.constant 3 : index
    %c0_11 = arith.constant 0 : index
    %c0_12 = arith.constant 0 : index
    %9 = vector.load %arg6[%c0_10, %c3, %c0_11, %c0_12] : memref<1x13x8x128xf32, #tpu.memory_space<vmem>>, vector<1x1x8x128xf32>
    %10 = vector.shape_cast %9 : vector<1x1x8x128xf32> to vector<8x128xf32>
    %c0_13 = arith.constant 0 : index
    %c4 = arith.constant 4 : index
    %c0_14 = arith.constant 0 : index
    %c0_15 = arith.constant 0 : index
    %11 = vector.load %arg6[%c0_13, %c4, %c0_14, %c0_15] : memref<1x13x8x128xf32, #tpu.memory_space<vmem>>, vector<1x1x8x128xf32>
    %12 = vector.shape_cast %11 : vector<1x1x8x128xf32> to vector<8x128xf32>
    %c0_16 = arith.constant 0 : index
    %c5 = arith.constant 5 : index
    %c0_17 = arith.constant 0 : index
    %c0_18 = arith.constant 0 : index
    %13 = vector.load %arg6[%c0_16, %c5, %c0_17, %c0_18] : memref<1x13x8x128xf32, #tpu.memory_space<vmem>>, vector<1x1x8x128xf32>
    %14 = vector.shape_cast %13 : vector<1x1x8x128xf32> to vector<8x128xf32>
    %c0_19 = arith.constant 0 : index
    %c6 = arith.constant 6 : index
    %c0_20 = arith.constant 0 : index
    %c0_21 = arith.constant 0 : index
    %15 = vector.load %arg6[%c0_19, %c6, %c0_20, %c0_21] : memref<1x13x8x128xf32, #tpu.memory_space<vmem>>, vector<1x1x8x128xf32>
    %16 = vector.shape_cast %15 : vector<1x1x8x128xf32> to vector<8x128xf32>
    %c0_22 = arith.constant 0 : index
    %c7 = arith.constant 7 : index
    %c0_23 = arith.constant 0 : index
    %c0_24 = arith.constant 0 : index
    %17 = vector.load %arg6[%c0_22, %c7, %c0_23, %c0_24] : memref<1x13x8x128xf32, #tpu.memory_space<vmem>>, vector<1x1x8x128xf32>
    %18 = vector.shape_cast %17 : vector<1x1x8x128xf32> to vector<8x128xf32>
    %c0_25 = arith.constant 0 : index
    %c8 = arith.constant 8 : index
    %c0_26 = arith.constant 0 : index
    %c0_27 = arith.constant 0 : index
    %19 = vector.load %arg6[%c0_25, %c8, %c0_26, %c0_27] : memref<1x13x8x128xf32, #tpu.memory_space<vmem>>, vector<1x1x8x128xf32>
    %20 = vector.shape_cast %19 : vector<1x1x8x128xf32> to vector<8x128xf32>
    %c0_28 = arith.constant 0 : index
    %c9 = arith.constant 9 : index
    %c0_29 = arith.constant 0 : index
    %c0_30 = arith.constant 0 : index
    %21 = vector.load %arg6[%c0_28, %c9, %c0_29, %c0_30] : memref<1x13x8x128xf32, #tpu.memory_space<vmem>>, vector<1x1x8x128xf32>
    %22 = vector.shape_cast %21 : vector<1x1x8x128xf32> to vector<8x128xf32>
    %c0_31 = arith.constant 0 : index
    %c10 = arith.constant 10 : index
    %c0_32 = arith.constant 0 : index
    %c0_33 = arith.constant 0 : index
    %23 = vector.load %arg6[%c0_31, %c10, %c0_32, %c0_33] : memref<1x13x8x128xf32, #tpu.memory_space<vmem>>, vector<1x1x8x128xf32>
    %24 = vector.shape_cast %23 : vector<1x1x8x128xf32> to vector<8x128xf32>
    %c0_34 = arith.constant 0 : index
    %c11 = arith.constant 11 : index
    %c0_35 = arith.constant 0 : index
    %c0_36 = arith.constant 0 : index
    %25 = vector.load %arg6[%c0_34, %c11, %c0_35, %c0_36] : memref<1x13x8x128xf32, #tpu.memory_space<vmem>>, vector<1x1x8x128xf32>
    %26 = vector.shape_cast %25 : vector<1x1x8x128xf32> to vector<8x128xf32>
    %c0_37 = arith.constant 0 : index
    %c12 = arith.constant 12 : index
    %c0_38 = arith.constant 0 : index
    %c0_39 = arith.constant 0 : index
    %27 = vector.load %arg6[%c0_37, %c12, %c0_38, %c0_39] : memref<1x13x8x128xf32, #tpu.memory_space<vmem>>, vector<1x1x8x128xf32>
    %28 = vector.shape_cast %27 : vector<1x1x8x128xf32> to vector<8x128xf32>
    %c0_i32_40 = arith.constant 0 : i32
    %c32_i32 = arith.constant 32 : i32
    %29 = arith.muli %c0_i32_40, %c32_i32 : i32
    %30 = tpu.assume_multiple %29, 32 : i32
    %c0_41 = arith.constant 0 : index
    %c0_42 = arith.constant 0 : index
    %31 = arith.index_cast %30 : i32 to index
    %c0_43 = arith.constant 0 : index
    %32 = vector.load %arg2[%c0_41, %c0_42, %31, %c0_43] : memref<1x1x64x128xf32, #tpu.memory_space<vmem>>, vector<1x1x32x128xf32>
    %33 = vector.shape_cast %32 : vector<1x1x32x128xf32> to vector<32x128xf32>
    %c0_44 = arith.constant 0 : index
    %c0_45 = arith.constant 0 : index
    %34 = arith.index_cast %30 : i32 to index
    %c0_46 = arith.constant 0 : index
    %35 = vector.load %arg3[%c0_44, %c0_45, %34, %c0_46] : memref<1x1x64x128xf32, #tpu.memory_space<vmem>>, vector<1x1x32x128xf32>
    %36 = vector.shape_cast %35 : vector<1x1x32x128xf32> to vector<32x128xf32>
    %c0_47 = arith.constant 0 : index
    %37 = arith.index_cast %30 : i32 to index
    %c0_48 = arith.constant 0 : index
    %38 = vector.load %arg4[%c0_47, %37, %c0_48] : memref<1x64x128xi8, #tpu.memory_space<vmem>>, vector<1x32x128xi8>
    %39 = vector.shape_cast %38 : vector<1x32x128xi8> to vector<32x128xi8>
    %40 = arith.sitofp %39 : vector<32x128xi8> to vector<32x128xf32>
    %c0_49 = arith.constant 0 : index
    %41 = arith.index_cast %30 : i32 to index
    %c0_50 = arith.constant 0 : index
    %42 = vector.load %arg5[%c0_49, %41, %c0_50] : memref<1x64x128xi8, #tpu.memory_space<vmem>>, vector<1x32x128xi8>
    %43 = vector.shape_cast %42 : vector<1x32x128xi8> to vector<32x128xi8>
    %44 = arith.sitofp %43 : vector<32x128xi8> to vector<32x128xf32>
    %45 = vector.extract_strided_slice %33 {offsets = [0, 0], sizes = [8, 128], strides = [1, 1]} : vector<32x128xf32> to vector<8x128xf32>
    %46 = vector.extract_strided_slice %36 {offsets = [0, 0], sizes = [8, 128], strides = [1, 1]} : vector<32x128xf32> to vector<8x128xf32>
    %47 = vector.extract_strided_slice %40 {offsets = [0, 0], sizes = [8, 128], strides = [1, 1]} : vector<32x128xf32> to vector<8x128xf32>
    %48 = vector.extract_strided_slice %44 {offsets = [0, 0], sizes = [8, 128], strides = [1, 1]} : vector<32x128xf32> to vector<8x128xf32>
    %cst = arith.constant 1.000000e+00 : f32
    %49 = vector.broadcast %cst : f32 to vector<8x128xf32>
    %50 = arith.cmpf oeq, %47, %49 : vector<8x128xf32>
    %51 = arith.extui %50 : vector<8x128xi1> to vector<8x128xi32>
    %52 = arith.sitofp %51 : vector<8x128xi32> to vector<8x128xf32>
    %cst_51 = arith.constant 2.000000e+00 : f32
    %53 = vector.broadcast %cst_51 : f32 to vector<8x128xf32>
    %54 = arith.cmpf oeq, %47, %53 : vector<8x128xf32>
    %55 = arith.extui %54 : vector<8x128xi1> to vector<8x128xi32>
    %56 = arith.sitofp %55 : vector<8x128xi32> to vector<8x128xf32>
    %57 = arith.maximumf %4, %47 : vector<8x128xf32>
    %58 = arith.mulf %52, %45 : vector<8x128xf32>
    %59 = arith.mulf %56, %46 : vector<8x128xf32>
    %60 = arith.addf %6, %58 : vector<8x128xf32>
    %61 = arith.addf %8, %45 : vector<8x128xf32>
    %62 = arith.addf %10, %52 : vector<8x128xf32>
    %63 = arith.mulf %58, %48 : vector<8x128xf32>
    %64 = arith.addf %12, %63 : vector<8x128xf32>
    %65 = arith.mulf %45, %48 : vector<8x128xf32>
    %66 = arith.addf %14, %65 : vector<8x128xf32>
    %67 = arith.mulf %52, %48 : vector<8x128xf32>
    %68 = arith.addf %16, %67 : vector<8x128xf32>
    %69 = arith.addf %18, %59 : vector<8x128xf32>
    %70 = arith.addf %20, %46 : vector<8x128xf32>
    %71 = arith.addf %22, %56 : vector<8x128xf32>
    %72 = arith.mulf %59, %48 : vector<8x128xf32>
    %73 = arith.addf %24, %72 : vector<8x128xf32>
    %74 = arith.mulf %46, %48 : vector<8x128xf32>
    %75 = arith.addf %26, %74 : vector<8x128xf32>
    %76 = arith.mulf %56, %48 : vector<8x128xf32>
    %77 = arith.addf %28, %76 : vector<8x128xf32>
    %78 = vector.extract_strided_slice %33 {offsets = [8, 0], sizes = [8, 128], strides = [1, 1]} : vector<32x128xf32> to vector<8x128xf32>
    %79 = vector.extract_strided_slice %36 {offsets = [8, 0], sizes = [8, 128], strides = [1, 1]} : vector<32x128xf32> to vector<8x128xf32>
    %80 = vector.extract_strided_slice %40 {offsets = [8, 0], sizes = [8, 128], strides = [1, 1]} : vector<32x128xf32> to vector<8x128xf32>
    %81 = vector.extract_strided_slice %44 {offsets = [8, 0], sizes = [8, 128], strides = [1, 1]} : vector<32x128xf32> to vector<8x128xf32>
    %cst_52 = arith.constant 1.000000e+00 : f32
    %82 = vector.broadcast %cst_52 : f32 to vector<8x128xf32>
    %83 = arith.cmpf oeq, %80, %82 : vector<8x128xf32>
    %84 = arith.extui %83 : vector<8x128xi1> to vector<8x128xi32>
    %85 = arith.sitofp %84 : vector<8x128xi32> to vector<8x128xf32>
    %cst_53 = arith.constant 2.000000e+00 : f32
    %86 = vector.broadcast %cst_53 : f32 to vector<8x128xf32>
    %87 = arith.cmpf oeq, %80, %86 : vector<8x128xf32>
    %88 = arith.extui %87 : vector<8x128xi1> to vector<8x128xi32>
    %89 = arith.sitofp %88 : vector<8x128xi32> to vector<8x128xf32>
    %90 = arith.maximumf %57, %80 : vector<8x128xf32>
    %91 = arith.mulf %85, %78 : vector<8x128xf32>
    %92 = arith.mulf %89, %79 : vector<8x128xf32>
    %93 = arith.addf %60, %91 : vector<8x128xf32>
    %94 = arith.addf %61, %78 : vector<8x128xf32>
    %95 = arith.addf %62, %85 : vector<8x128xf32>
    %96 = arith.mulf %91, %81 : vector<8x128xf32>
    %97 = arith.addf %64, %96 : vector<8x128xf32>
    %98 = arith.mulf %78, %81 : vector<8x128xf32>
    %99 = arith.addf %66, %98 : vector<8x128xf32>
    %100 = arith.mulf %85, %81 : vector<8x128xf32>
    %101 = arith.addf %68, %100 : vector<8x128xf32>
    %102 = arith.addf %69, %92 : vector<8x128xf32>
    %103 = arith.addf %70, %79 : vector<8x128xf32>
    %104 = arith.addf %71, %89 : vector<8x128xf32>
    %105 = arith.mulf %92, %81 : vector<8x128xf32>
    %106 = arith.addf %73, %105 : vector<8x128xf32>
    %107 = arith.mulf %79, %81 : vector<8x128xf32>
    %108 = arith.addf %75, %107 : vector<8x128xf32>
    %109 = arith.mulf %89, %81 : vector<8x128xf32>
    %110 = arith.addf %77, %109 : vector<8x128xf32>
    %111 = vector.extract_strided_slice %33 {offsets = [16, 0], sizes = [8, 128], strides = [1, 1]} : vector<32x128xf32> to vector<8x128xf32>
    %112 = vector.extract_strided_slice %36 {offsets = [16, 0], sizes = [8, 128], strides = [1, 1]} : vector<32x128xf32> to vector<8x128xf32>
    %113 = vector.extract_strided_slice %40 {offsets = [16, 0], sizes = [8, 128], strides = [1, 1]} : vector<32x128xf32> to vector<8x128xf32>
    %114 = vector.extract_strided_slice %44 {offsets = [16, 0], sizes = [8, 128], strides = [1, 1]} : vector<32x128xf32> to vector<8x128xf32>
    %cst_54 = arith.constant 1.000000e+00 : f32
    %115 = vector.broadcast %cst_54 : f32 to vector<8x128xf32>
    %116 = arith.cmpf oeq, %113, %115 : vector<8x128xf32>
    %117 = arith.extui %116 : vector<8x128xi1> to vector<8x128xi32>
    %118 = arith.sitofp %117 : vector<8x128xi32> to vector<8x128xf32>
    %cst_55 = arith.constant 2.000000e+00 : f32
    %119 = vector.broadcast %cst_55 : f32 to vector<8x128xf32>
    %120 = arith.cmpf oeq, %113, %119 : vector<8x128xf32>
    %121 = arith.extui %120 : vector<8x128xi1> to vector<8x128xi32>
    %122 = arith.sitofp %121 : vector<8x128xi32> to vector<8x128xf32>
    %123 = arith.maximumf %90, %113 : vector<8x128xf32>
    %124 = arith.mulf %118, %111 : vector<8x128xf32>
    %125 = arith.mulf %122, %112 : vector<8x128xf32>
    %126 = arith.addf %93, %124 : vector<8x128xf32>
    %127 = arith.addf %94, %111 : vector<8x128xf32>
    %128 = arith.addf %95, %118 : vector<8x128xf32>
    %129 = arith.mulf %124, %114 : vector<8x128xf32>
    %130 = arith.addf %97, %129 : vector<8x128xf32>
    %131 = arith.mulf %111, %114 : vector<8x128xf32>
    %132 = arith.addf %99, %131 : vector<8x128xf32>
    %133 = arith.mulf %118, %114 : vector<8x128xf32>
    %134 = arith.addf %101, %133 : vector<8x128xf32>
    %135 = arith.addf %102, %125 : vector<8x128xf32>
    %136 = arith.addf %103, %112 : vector<8x128xf32>
    %137 = arith.addf %104, %122 : vector<8x128xf32>
    %138 = arith.mulf %125, %114 : vector<8x128xf32>
    %139 = arith.addf %106, %138 : vector<8x128xf32>
    %140 = arith.mulf %112, %114 : vector<8x128xf32>
    %141 = arith.addf %108, %140 : vector<8x128xf32>
    %142 = arith.mulf %122, %114 : vector<8x128xf32>
    %143 = arith.addf %110, %142 : vector<8x128xf32>
    %144 = vector.extract_strided_slice %33 {offsets = [24, 0], sizes = [8, 128], strides = [1, 1]} : vector<32x128xf32> to vector<8x128xf32>
    %145 = vector.extract_strided_slice %36 {offsets = [24, 0], sizes = [8, 128], strides = [1, 1]} : vector<32x128xf32> to vector<8x128xf32>
    %146 = vector.extract_strided_slice %40 {offsets = [24, 0], sizes = [8, 128], strides = [1, 1]} : vector<32x128xf32> to vector<8x128xf32>
    %147 = vector.extract_strided_slice %44 {offsets = [24, 0], sizes = [8, 128], strides = [1, 1]} : vector<32x128xf32> to vector<8x128xf32>
    %cst_56 = arith.constant 1.000000e+00 : f32
    %148 = vector.broadcast %cst_56 : f32 to vector<8x128xf32>
    %149 = arith.cmpf oeq, %146, %148 : vector<8x128xf32>
    %150 = arith.extui %149 : vector<8x128xi1> to vector<8x128xi32>
    %151 = arith.sitofp %150 : vector<8x128xi32> to vector<8x128xf32>
    %cst_57 = arith.constant 2.000000e+00 : f32
    %152 = vector.broadcast %cst_57 : f32 to vector<8x128xf32>
    %153 = arith.cmpf oeq, %146, %152 : vector<8x128xf32>
    %154 = arith.extui %153 : vector<8x128xi1> to vector<8x128xi32>
    %155 = arith.sitofp %154 : vector<8x128xi32> to vector<8x128xf32>
    %156 = arith.maximumf %123, %146 : vector<8x128xf32>
    %157 = arith.mulf %151, %144 : vector<8x128xf32>
    %158 = arith.mulf %155, %145 : vector<8x128xf32>
    %159 = arith.addf %126, %157 : vector<8x128xf32>
    %160 = arith.addf %127, %144 : vector<8x128xf32>
    %161 = arith.addf %128, %151 : vector<8x128xf32>
    %162 = arith.mulf %157, %147 : vector<8x128xf32>
    %163 = arith.addf %130, %162 : vector<8x128xf32>
    %164 = arith.mulf %144, %147 : vector<8x128xf32>
    %165 = arith.addf %132, %164 : vector<8x128xf32>
    %166 = arith.mulf %151, %147 : vector<8x128xf32>
    %167 = arith.addf %134, %166 : vector<8x128xf32>
    %168 = arith.addf %135, %158 : vector<8x128xf32>
    %169 = arith.addf %136, %145 : vector<8x128xf32>
    %170 = arith.addf %137, %155 : vector<8x128xf32>
    %171 = arith.mulf %158, %147 : vector<8x128xf32>
    %172 = arith.addf %139, %171 : vector<8x128xf32>
    %173 = arith.mulf %145, %147 : vector<8x128xf32>
    %174 = arith.addf %141, %173 : vector<8x128xf32>
    %175 = arith.mulf %155, %147 : vector<8x128xf32>
    %176 = arith.addf %143, %175 : vector<8x128xf32>
    %c1_i32 = arith.constant 1 : i32
    %c32_i32_58 = arith.constant 32 : i32
    %177 = arith.muli %c1_i32, %c32_i32_58 : i32
    %178 = tpu.assume_multiple %177, 32 : i32
    %c0_59 = arith.constant 0 : index
    %c0_60 = arith.constant 0 : index
    %179 = arith.index_cast %178 : i32 to index
    %c0_61 = arith.constant 0 : index
    %180 = vector.load %arg2[%c0_59, %c0_60, %179, %c0_61] : memref<1x1x64x128xf32, #tpu.memory_space<vmem>>, vector<1x1x32x128xf32>
    %181 = vector.shape_cast %180 : vector<1x1x32x128xf32> to vector<32x128xf32>
    %c0_62 = arith.constant 0 : index
    %c0_63 = arith.constant 0 : index
    %182 = arith.index_cast %178 : i32 to index
    %c0_64 = arith.constant 0 : index
    %183 = vector.load %arg3[%c0_62, %c0_63, %182, %c0_64] : memref<1x1x64x128xf32, #tpu.memory_space<vmem>>, vector<1x1x32x128xf32>
    %184 = vector.shape_cast %183 : vector<1x1x32x128xf32> to vector<32x128xf32>
    %c0_65 = arith.constant 0 : index
    %185 = arith.index_cast %178 : i32 to index
    %c0_66 = arith.constant 0 : index
    %186 = vector.load %arg4[%c0_65, %185, %c0_66] : memref<1x64x128xi8, #tpu.memory_space<vmem>>, vector<1x32x128xi8>
    %187 = vector.shape_cast %186 : vector<1x32x128xi8> to vector<32x128xi8>
    %188 = arith.sitofp %187 : vector<32x128xi8> to vector<32x128xf32>
    %c0_67 = arith.constant 0 : index
    %189 = arith.index_cast %178 : i32 to index
    %c0_68 = arith.constant 0 : index
    %190 = vector.load %arg5[%c0_67, %189, %c0_68] : memref<1x64x128xi8, #tpu.memory_space<vmem>>, vector<1x32x128xi8>
    %191 = vector.shape_cast %190 : vector<1x32x128xi8> to vector<32x128xi8>
    %192 = arith.sitofp %191 : vector<32x128xi8> to vector<32x128xf32>
    %193 = vector.extract_strided_slice %181 {offsets = [0, 0], sizes = [8, 128], strides = [1, 1]} : vector<32x128xf32> to vector<8x128xf32>
    %194 = vector.extract_strided_slice %184 {offsets = [0, 0], sizes = [8, 128], strides = [1, 1]} : vector<32x128xf32> to vector<8x128xf32>
    %195 = vector.extract_strided_slice %188 {offsets = [0, 0], sizes = [8, 128], strides = [1, 1]} : vector<32x128xf32> to vector<8x128xf32>
    %196 = vector.extract_strided_slice %192 {offsets = [0, 0], sizes = [8, 128], strides = [1, 1]} : vector<32x128xf32> to vector<8x128xf32>
    %cst_69 = arith.constant 1.000000e+00 : f32
    %197 = vector.broadcast %cst_69 : f32 to vector<8x128xf32>
    %198 = arith.cmpf oeq, %195, %197 : vector<8x128xf32>
    %199 = arith.extui %198 : vector<8x128xi1> to vector<8x128xi32>
    %200 = arith.sitofp %199 : vector<8x128xi32> to vector<8x128xf32>
    %cst_70 = arith.constant 2.000000e+00 : f32
    %201 = vector.broadcast %cst_70 : f32 to vector<8x128xf32>
    %202 = arith.cmpf oeq, %195, %201 : vector<8x128xf32>
    %203 = arith.extui %202 : vector<8x128xi1> to vector<8x128xi32>
    %204 = arith.sitofp %203 : vector<8x128xi32> to vector<8x128xf32>
    %205 = arith.maximumf %156, %195 : vector<8x128xf32>
    %206 = arith.mulf %200, %193 : vector<8x128xf32>
    %207 = arith.mulf %204, %194 : vector<8x128xf32>
    %208 = arith.addf %159, %206 : vector<8x128xf32>
    %209 = arith.addf %160, %193 : vector<8x128xf32>
    %210 = arith.addf %161, %200 : vector<8x128xf32>
    %211 = arith.mulf %206, %196 : vector<8x128xf32>
    %212 = arith.addf %163, %211 : vector<8x128xf32>
    %213 = arith.mulf %193, %196 : vector<8x128xf32>
    %214 = arith.addf %165, %213 : vector<8x128xf32>
    %215 = arith.mulf %200, %196 : vector<8x128xf32>
    %216 = arith.addf %167, %215 : vector<8x128xf32>
    %217 = arith.addf %168, %207 : vector<8x128xf32>
    %218 = arith.addf %169, %194 : vector<8x128xf32>
    %219 = arith.addf %170, %204 : vector<8x128xf32>
    %220 = arith.mulf %207, %196 : vector<8x128xf32>
    %221 = arith.addf %172, %220 : vector<8x128xf32>
    %222 = arith.mulf %194, %196 : vector<8x128xf32>
    %223 = arith.addf %174, %222 : vector<8x128xf32>
    %224 = arith.mulf %204, %196 : vector<8x128xf32>
    %225 = arith.addf %176, %224 : vector<8x128xf32>
    %226 = vector.extract_strided_slice %181 {offsets = [8, 0], sizes = [8, 128], strides = [1, 1]} : vector<32x128xf32> to vector<8x128xf32>
    %227 = vector.extract_strided_slice %184 {offsets = [8, 0], sizes = [8, 128], strides = [1, 1]} : vector<32x128xf32> to vector<8x128xf32>
    %228 = vector.extract_strided_slice %188 {offsets = [8, 0], sizes = [8, 128], strides = [1, 1]} : vector<32x128xf32> to vector<8x128xf32>
    %229 = vector.extract_strided_slice %192 {offsets = [8, 0], sizes = [8, 128], strides = [1, 1]} : vector<32x128xf32> to vector<8x128xf32>
    %cst_71 = arith.constant 1.000000e+00 : f32
    %230 = vector.broadcast %cst_71 : f32 to vector<8x128xf32>
    %231 = arith.cmpf oeq, %228, %230 : vector<8x128xf32>
    %232 = arith.extui %231 : vector<8x128xi1> to vector<8x128xi32>
    %233 = arith.sitofp %232 : vector<8x128xi32> to vector<8x128xf32>
    %cst_72 = arith.constant 2.000000e+00 : f32
    %234 = vector.broadcast %cst_72 : f32 to vector<8x128xf32>
    %235 = arith.cmpf oeq, %228, %234 : vector<8x128xf32>
    %236 = arith.extui %235 : vector<8x128xi1> to vector<8x128xi32>
    %237 = arith.sitofp %236 : vector<8x128xi32> to vector<8x128xf32>
    %238 = arith.maximumf %205, %228 : vector<8x128xf32>
    %239 = arith.mulf %233, %226 : vector<8x128xf32>
    %240 = arith.mulf %237, %227 : vector<8x128xf32>
    %241 = arith.addf %208, %239 : vector<8x128xf32>
    %242 = arith.addf %209, %226 : vector<8x128xf32>
    %243 = arith.addf %210, %233 : vector<8x128xf32>
    %244 = arith.mulf %239, %229 : vector<8x128xf32>
    %245 = arith.addf %212, %244 : vector<8x128xf32>
    %246 = arith.mulf %226, %229 : vector<8x128xf32>
    %247 = arith.addf %214, %246 : vector<8x128xf32>
    %248 = arith.mulf %233, %229 : vector<8x128xf32>
    %249 = arith.addf %216, %248 : vector<8x128xf32>
    %250 = arith.addf %217, %240 : vector<8x128xf32>
    %251 = arith.addf %218, %227 : vector<8x128xf32>
    %252 = arith.addf %219, %237 : vector<8x128xf32>
    %253 = arith.mulf %240, %229 : vector<8x128xf32>
    %254 = arith.addf %221, %253 : vector<8x128xf32>
    %255 = arith.mulf %227, %229 : vector<8x128xf32>
    %256 = arith.addf %223, %255 : vector<8x128xf32>
    %257 = arith.mulf %237, %229 : vector<8x128xf32>
    %258 = arith.addf %225, %257 : vector<8x128xf32>
    %259 = vector.extract_strided_slice %181 {offsets = [16, 0], sizes = [8, 128], strides = [1, 1]} : vector<32x128xf32> to vector<8x128xf32>
    %260 = vector.extract_strided_slice %184 {offsets = [16, 0], sizes = [8, 128], strides = [1, 1]} : vector<32x128xf32> to vector<8x128xf32>
    %261 = vector.extract_strided_slice %188 {offsets = [16, 0], sizes = [8, 128], strides = [1, 1]} : vector<32x128xf32> to vector<8x128xf32>
    %262 = vector.extract_strided_slice %192 {offsets = [16, 0], sizes = [8, 128], strides = [1, 1]} : vector<32x128xf32> to vector<8x128xf32>
    %cst_73 = arith.constant 1.000000e+00 : f32
    %263 = vector.broadcast %cst_73 : f32 to vector<8x128xf32>
    %264 = arith.cmpf oeq, %261, %263 : vector<8x128xf32>
    %265 = arith.extui %264 : vector<8x128xi1> to vector<8x128xi32>
    %266 = arith.sitofp %265 : vector<8x128xi32> to vector<8x128xf32>
    %cst_74 = arith.constant 2.000000e+00 : f32
    %267 = vector.broadcast %cst_74 : f32 to vector<8x128xf32>
    %268 = arith.cmpf oeq, %261, %267 : vector<8x128xf32>
    %269 = arith.extui %268 : vector<8x128xi1> to vector<8x128xi32>
    %270 = arith.sitofp %269 : vector<8x128xi32> to vector<8x128xf32>
    %271 = arith.maximumf %238, %261 : vector<8x128xf32>
    %272 = arith.mulf %266, %259 : vector<8x128xf32>
    %273 = arith.mulf %270, %260 : vector<8x128xf32>
    %274 = arith.addf %241, %272 : vector<8x128xf32>
    %275 = arith.addf %242, %259 : vector<8x128xf32>
    %276 = arith.addf %243, %266 : vector<8x128xf32>
    %277 = arith.mulf %272, %262 : vector<8x128xf32>
    %278 = arith.addf %245, %277 : vector<8x128xf32>
    %279 = arith.mulf %259, %262 : vector<8x128xf32>
    %280 = arith.addf %247, %279 : vector<8x128xf32>
    %281 = arith.mulf %266, %262 : vector<8x128xf32>
    %282 = arith.addf %249, %281 : vector<8x128xf32>
    %283 = arith.addf %250, %273 : vector<8x128xf32>
    %284 = arith.addf %251, %260 : vector<8x128xf32>
    %285 = arith.addf %252, %270 : vector<8x128xf32>
    %286 = arith.mulf %273, %262 : vector<8x128xf32>
    %287 = arith.addf %254, %286 : vector<8x128xf32>
    %288 = arith.mulf %260, %262 : vector<8x128xf32>
    %289 = arith.addf %256, %288 : vector<8x128xf32>
    %290 = arith.mulf %270, %262 : vector<8x128xf32>
    %291 = arith.addf %258, %290 : vector<8x128xf32>
    %292 = vector.extract_strided_slice %181 {offsets = [24, 0], sizes = [8, 128], strides = [1, 1]} : vector<32x128xf32> to vector<8x128xf32>
    %293 = vector.extract_strided_slice %184 {offsets = [24, 0], sizes = [8, 128], strides = [1, 1]} : vector<32x128xf32> to vector<8x128xf32>
    %294 = vector.extract_strided_slice %188 {offsets = [24, 0], sizes = [8, 128], strides = [1, 1]} : vector<32x128xf32> to vector<8x128xf32>
    %295 = vector.extract_strided_slice %192 {offsets = [24, 0], sizes = [8, 128], strides = [1, 1]} : vector<32x128xf32> to vector<8x128xf32>
    %cst_75 = arith.constant 1.000000e+00 : f32
    %296 = vector.broadcast %cst_75 : f32 to vector<8x128xf32>
    %297 = arith.cmpf oeq, %294, %296 : vector<8x128xf32>
    %298 = arith.extui %297 : vector<8x128xi1> to vector<8x128xi32>
    %299 = arith.sitofp %298 : vector<8x128xi32> to vector<8x128xf32>
    %cst_76 = arith.constant 2.000000e+00 : f32
    %300 = vector.broadcast %cst_76 : f32 to vector<8x128xf32>
    %301 = arith.cmpf oeq, %294, %300 : vector<8x128xf32>
    %302 = arith.extui %301 : vector<8x128xi1> to vector<8x128xi32>
    %303 = arith.sitofp %302 : vector<8x128xi32> to vector<8x128xf32>
    %304 = arith.maximumf %271, %294 : vector<8x128xf32>
    %305 = arith.mulf %299, %292 : vector<8x128xf32>
    %306 = arith.mulf %303, %293 : vector<8x128xf32>
    %307 = arith.addf %274, %305 : vector<8x128xf32>
    %308 = arith.addf %275, %292 : vector<8x128xf32>
    %309 = arith.addf %276, %299 : vector<8x128xf32>
    %310 = arith.mulf %305, %295 : vector<8x128xf32>
    %311 = arith.addf %278, %310 : vector<8x128xf32>
    %312 = arith.mulf %292, %295 : vector<8x128xf32>
    %313 = arith.addf %280, %312 : vector<8x128xf32>
    %314 = arith.mulf %299, %295 : vector<8x128xf32>
    %315 = arith.addf %282, %314 : vector<8x128xf32>
    %316 = arith.addf %283, %306 : vector<8x128xf32>
    %317 = arith.addf %284, %293 : vector<8x128xf32>
    %318 = arith.addf %285, %303 : vector<8x128xf32>
    %319 = arith.mulf %306, %295 : vector<8x128xf32>
    %320 = arith.addf %287, %319 : vector<8x128xf32>
    %321 = arith.mulf %293, %295 : vector<8x128xf32>
    %322 = arith.addf %289, %321 : vector<8x128xf32>
    %323 = arith.mulf %303, %295 : vector<8x128xf32>
    %324 = arith.addf %291, %323 : vector<8x128xf32>
    %c2_i32 = arith.constant 2 : i32
    %c0_77 = arith.constant 0 : index
    %c0_78 = arith.constant 0 : index
    %c0_79 = arith.constant 0 : index
    %c0_80 = arith.constant 0 : index
    %325 = vector.load %arg6[%c0_77, %c0_78, %c0_79, %c0_80] : memref<1x13x8x128xf32, #tpu.memory_space<vmem>>, vector<1x1x8x128xf32>
    %326 = vector.shape_cast %325 : vector<1x1x8x128xf32> to vector<8x128xf32>
    %327 = vector.shape_cast %304 : vector<8x128xf32> to vector<1x1x8x128xf32>
    tpu.vector_store %arg6[%c0_77, %c0_78, %c0_79, %c0_80], %327 {strides = array<i32>} : memref<1x13x8x128xf32, #tpu.memory_space<vmem>>, vector<1x1x8x128xf32>,
    %c0_81 = arith.constant 0 : index
    %c1_82 = arith.constant 1 : index
    %c0_83 = arith.constant 0 : index
    %c0_84 = arith.constant 0 : index
    %328 = vector.load %arg6[%c0_81, %c1_82, %c0_83, %c0_84] : memref<1x13x8x128xf32, #tpu.memory_space<vmem>>, vector<1x1x8x128xf32>
    %329 = vector.shape_cast %328 : vector<1x1x8x128xf32> to vector<8x128xf32>
    %330 = vector.shape_cast %307 : vector<8x128xf32> to vector<1x1x8x128xf32>
    tpu.vector_store %arg6[%c0_81, %c1_82, %c0_83, %c0_84], %330 {strides = array<i32>} : memref<1x13x8x128xf32, #tpu.memory_space<vmem>>, vector<1x1x8x128xf32>,
    %c0_85 = arith.constant 0 : index
    %c2_86 = arith.constant 2 : index
    %c0_87 = arith.constant 0 : index
    %c0_88 = arith.constant 0 : index
    %331 = vector.load %arg6[%c0_85, %c2_86, %c0_87, %c0_88] : memref<1x13x8x128xf32, #tpu.memory_space<vmem>>, vector<1x1x8x128xf32>
    %332 = vector.shape_cast %331 : vector<1x1x8x128xf32> to vector<8x128xf32>
    %333 = vector.shape_cast %308 : vector<8x128xf32> to vector<1x1x8x128xf32>
    tpu.vector_store %arg6[%c0_85, %c2_86, %c0_87, %c0_88], %333 {strides = array<i32>} : memref<1x13x8x128xf32, #tpu.memory_space<vmem>>, vector<1x1x8x128xf32>,
    %c0_89 = arith.constant 0 : index
    %c3_90 = arith.constant 3 : index
    %c0_91 = arith.constant 0 : index
    %c0_92 = arith.constant 0 : index
    %334 = vector.load %arg6[%c0_89, %c3_90, %c0_91, %c0_92] : memref<1x13x8x128xf32, #tpu.memory_space<vmem>>, vector<1x1x8x128xf32>
    %335 = vector.shape_cast %334 : vector<1x1x8x128xf32> to vector<8x128xf32>
    %336 = vector.shape_cast %309 : vector<8x128xf32> to vector<1x1x8x128xf32>
    tpu.vector_store %arg6[%c0_89, %c3_90, %c0_91, %c0_92], %336 {strides = array<i32>} : memref<1x13x8x128xf32, #tpu.memory_space<vmem>>, vector<1x1x8x128xf32>,
    %c0_93 = arith.constant 0 : index
    %c4_94 = arith.constant 4 : index
    %c0_95 = arith.constant 0 : index
    %c0_96 = arith.constant 0 : index
    %337 = vector.load %arg6[%c0_93, %c4_94, %c0_95, %c0_96] : memref<1x13x8x128xf32, #tpu.memory_space<vmem>>, vector<1x1x8x128xf32>
    %338 = vector.shape_cast %337 : vector<1x1x8x128xf32> to vector<8x128xf32>
    %339 = vector.shape_cast %311 : vector<8x128xf32> to vector<1x1x8x128xf32>
    tpu.vector_store %arg6[%c0_93, %c4_94, %c0_95, %c0_96], %339 {strides = array<i32>} : memref<1x13x8x128xf32, #tpu.memory_space<vmem>>, vector<1x1x8x128xf32>,
    %c0_97 = arith.constant 0 : index
    %c5_98 = arith.constant 5 : index
    %c0_99 = arith.constant 0 : index
    %c0_100 = arith.constant 0 : index
    %340 = vector.load %arg6[%c0_97, %c5_98, %c0_99, %c0_100] : memref<1x13x8x128xf32, #tpu.memory_space<vmem>>, vector<1x1x8x128xf32>
    %341 = vector.shape_cast %340 : vector<1x1x8x128xf32> to vector<8x128xf32>
    %342 = vector.shape_cast %313 : vector<8x128xf32> to vector<1x1x8x128xf32>
    tpu.vector_store %arg6[%c0_97, %c5_98, %c0_99, %c0_100], %342 {strides = array<i32>} : memref<1x13x8x128xf32, #tpu.memory_space<vmem>>, vector<1x1x8x128xf32>,
    %c0_101 = arith.constant 0 : index
    %c6_102 = arith.constant 6 : index
    %c0_103 = arith.constant 0 : index
    %c0_104 = arith.constant 0 : index
    %343 = vector.load %arg6[%c0_101, %c6_102, %c0_103, %c0_104] : memref<1x13x8x128xf32, #tpu.memory_space<vmem>>, vector<1x1x8x128xf32>
    %344 = vector.shape_cast %343 : vector<1x1x8x128xf32> to vector<8x128xf32>
    %345 = vector.shape_cast %315 : vector<8x128xf32> to vector<1x1x8x128xf32>
    tpu.vector_store %arg6[%c0_101, %c6_102, %c0_103, %c0_104], %345 {strides = array<i32>} : memref<1x13x8x128xf32, #tpu.memory_space<vmem>>, vector<1x1x8x128xf32>,
    %c0_105 = arith.constant 0 : index
    %c7_106 = arith.constant 7 : index
    %c0_107 = arith.constant 0 : index
    %c0_108 = arith.constant 0 : index
    %346 = vector.load %arg6[%c0_105, %c7_106, %c0_107, %c0_108] : memref<1x13x8x128xf32, #tpu.memory_space<vmem>>, vector<1x1x8x128xf32>
    %347 = vector.shape_cast %346 : vector<1x1x8x128xf32> to vector<8x128xf32>
    %348 = vector.shape_cast %316 : vector<8x128xf32> to vector<1x1x8x128xf32>
    tpu.vector_store %arg6[%c0_105, %c7_106, %c0_107, %c0_108], %348 {strides = array<i32>} : memref<1x13x8x128xf32, #tpu.memory_space<vmem>>, vector<1x1x8x128xf32>,
    %c0_109 = arith.constant 0 : index
    %c8_110 = arith.constant 8 : index
    %c0_111 = arith.constant 0 : index
    %c0_112 = arith.constant 0 : index
    %349 = vector.load %arg6[%c0_109, %c8_110, %c0_111, %c0_112] : memref<1x13x8x128xf32, #tpu.memory_space<vmem>>, vector<1x1x8x128xf32>
    %350 = vector.shape_cast %349 : vector<1x1x8x128xf32> to vector<8x128xf32>
    %351 = vector.shape_cast %317 : vector<8x128xf32> to vector<1x1x8x128xf32>
    tpu.vector_store %arg6[%c0_109, %c8_110, %c0_111, %c0_112], %351 {strides = array<i32>} : memref<1x13x8x128xf32, #tpu.memory_space<vmem>>, vector<1x1x8x128xf32>,
    %c0_113 = arith.constant 0 : index
    %c9_114 = arith.constant 9 : index
    %c0_115 = arith.constant 0 : index
    %c0_116 = arith.constant 0 : index
    %352 = vector.load %arg6[%c0_113, %c9_114, %c0_115, %c0_116] : memref<1x13x8x128xf32, #tpu.memory_space<vmem>>, vector<1x1x8x128xf32>
    %353 = vector.shape_cast %352 : vector<1x1x8x128xf32> to vector<8x128xf32>
    %354 = vector.shape_cast %318 : vector<8x128xf32> to vector<1x1x8x128xf32>
    tpu.vector_store %arg6[%c0_113, %c9_114, %c0_115, %c0_116], %354 {strides = array<i32>} : memref<1x13x8x128xf32, #tpu.memory_space<vmem>>, vector<1x1x8x128xf32>,
    %c0_117 = arith.constant 0 : index
    %c10_118 = arith.constant 10 : index
    %c0_119 = arith.constant 0 : index
    %c0_120 = arith.constant 0 : index
    %355 = vector.load %arg6[%c0_117, %c10_118, %c0_119, %c0_120] : memref<1x13x8x128xf32, #tpu.memory_space<vmem>>, vector<1x1x8x128xf32>
    %356 = vector.shape_cast %355 : vector<1x1x8x128xf32> to vector<8x128xf32>
    %357 = vector.shape_cast %320 : vector<8x128xf32> to vector<1x1x8x128xf32>
    tpu.vector_store %arg6[%c0_117, %c10_118, %c0_119, %c0_120], %357 {strides = array<i32>} : memref<1x13x8x128xf32, #tpu.memory_space<vmem>>, vector<1x1x8x128xf32>,
    %c0_121 = arith.constant 0 : index
    %c11_122 = arith.constant 11 : index
    %c0_123 = arith.constant 0 : index
    %c0_124 = arith.constant 0 : index
    %358 = vector.load %arg6[%c0_121, %c11_122, %c0_123, %c0_124] : memref<1x13x8x128xf32, #tpu.memory_space<vmem>>, vector<1x1x8x128xf32>
    %359 = vector.shape_cast %358 : vector<1x1x8x128xf32> to vector<8x128xf32>
    %360 = vector.shape_cast %322 : vector<8x128xf32> to vector<1x1x8x128xf32>
    tpu.vector_store %arg6[%c0_121, %c11_122, %c0_123, %c0_124], %360 {strides = array<i32>} : memref<1x13x8x128xf32, #tpu.memory_space<vmem>>, vector<1x1x8x128xf32>,
    %c0_125 = arith.constant 0 : index
    %c12_126 = arith.constant 12 : index
    %c0_127 = arith.constant 0 : index
    %c0_128 = arith.constant 0 : index
    %361 = vector.load %arg6[%c0_125, %c12_126, %c0_127, %c0_128] : memref<1x13x8x128xf32, #tpu.memory_space<vmem>>, vector<1x1x8x128xf32>
    %362 = vector.shape_cast %361 : vector<1x1x8x128xf32> to vector<8x128xf32>
    %363 = vector.shape_cast %324 : vector<8x128xf32> to vector<1x1x8x128xf32>
    tpu.vector_store %arg6[%c0_125, %c12_126, %c0_127, %c0_128], %363 {strides = array<i32>} : memref<1x13x8x128xf32, #tpu.memory_space<vmem>>, vector<1x1x8x128xf32>,
    return
  }
  func.func @transform_0(%arg0: i32, %arg1: i32) -> (i32, i32, i32, i32) {
    %c1_i32 = arith.constant 1 : i32
    %c0_i32 = arith.constant 0 : i32
    %c0_i32_0 = arith.constant 0 : i32
    return %arg0, %c1_i32, %arg1, %c0_i32 : i32, i32, i32, i32
  }
  func.func @transform_1(%arg0: i32, %arg1: i32) -> (i32, i32, i32, i32) {
    %c2_i32 = arith.constant 2 : i32
    %c0_i32 = arith.constant 0 : i32
    %c0_i32_0 = arith.constant 0 : i32
    return %arg0, %c2_i32, %arg1, %c0_i32 : i32, i32, i32, i32
  }
  func.func @transform_2(%arg0: i32, %arg1: i32) -> (i32, i32, i32) {
    %c0_i32 = arith.constant 0 : i32
    %c0_i32_0 = arith.constant 0 : i32
    return %arg0, %arg1, %c0_i32 : i32, i32, i32
  }
  func.func @transform_3(%arg0: i32, %arg1: i32) -> (i32, i32, i32) {
    %c0_i32 = arith.constant 0 : i32
    %c0_i32_0 = arith.constant 0 : i32
    return %arg0, %arg1, %c0_i32 : i32, i32, i32
  }
  func.func @transform_4(%arg0: i32, %arg1: i32) -> (i32, i32, i32, i32) {
    %c0_i32 = arith.constant 0 : i32
    %c0_i32_0 = arith.constant 0 : i32
    %c0_i32_1 = arith.constant 0 : i32
    %c0_i32_2 = arith.constant 0 : i32
    return %arg0, %c0_i32, %c0_i32_0, %c0_i32_1 : i32, i32, i32, i32
  }
}

</mosaic_0001>

<bundles_post_ra>
// kernel: tpu_custom_call.1
= control target key start
LH: loop header
LB: loop body
LE: loop exit
PB: predicated region body
PF: predicated region fallthrough
CT: control target
= control target key end

     0   :  { %s1757_s0 = inlined_call_operand.hbm [shape: f32[2,3,64,128], index: 0, kind: input, shape index: {}]   ;;  %s1758_s1 = inlined_call_operand.hbm [shape: f32[2,3,64,128], index: 1, kind: input, shape index: {}]   ;;  %s1759_s2 = inlined_call_operand.hbm [shape: s8[2,64,128], index: 2, kind: input, shape index: {}]   ;;  %s1760_s3 = inlined_call_operand.hbm [shape: s8[2,64,128], index: 3, kind: input, shape index: {}]   ;;  %s1761_s4 = inlined_call_operand.hbm [shape: f32[2,13,8,128], index: 4, kind: output, shape index: {}]  }
   0x1   :  { %1765 = sst [smem:[#allocation19_spill]] %s1757_s0 }
   0x2   :  { %1766 = sst [smem:[#allocation20_spill]] %s1758_s1 }
   0x3   :  { %9 = vsyncpa [#allocation3], 0 }
   0x4   :  { %11 = vsyncpa [#allocation3 + $0x1], 0 }
   0x5   :  { %12 = vsyncpa [#allocation6], 0 }
   0x6   :  { %14 = vsyncpa [#allocation6 + $0x1], 0 }
   0x7   :  { %15 = vsyncpa [#allocation9], 0 }
   0x8   :  { %17 = vsyncpa [#allocation9 + $0x1], 0 }
   0x9   :  { %18 = vsyncpa [#allocation4], 0 }
   0xa   :  { %20 = vsyncpa [#allocation4 + $0x1], 0  ;;  %s1279_s15 = smov 0   ;;  %s1281_s16 = smov 0  }
   0xb   :  { %s1283_s17 = smov 0   ;;  %s1285_s18 = smov 0  }
   0xc   :  { %s1287_s19 = smov 0   ;;  %s1289_s20 = smov 0  }
   0xd LB: > { %1767 = sst [smem:[#allocation15_spill]] %s1235_s17  ;;  %s1310_s21 = sadd.s32 4294967295, %s1247_s20   ;;  %s1247_s20 = sphi %s1289_s20, %s26_s20   ;;  %s1243_s19 = sphi %s1287_s19, %s1786_s19   ;;  %s1239_s18 = sphi %s1285_s18, %s1785_s18   ;;  %s1235_s17 = sphi %s1283_s17, %s1781_s17   ;;  %s1231_s16 = sphi %s1281_s16, %s1784_s16   ;;  %s1227_s15 = sphi %s1279_s15, %s1783_s15  }
   0xe   : > { %s880_s22 = sadd.s32 4294967294, %s1247_s20   ;;  %s38_s23 = sadd.s32 1, %s1243_s19 }
   0xf   : > { %s47_s24 = sadd.s32 1, %s1235_s17  ;;  %p40_p0 = scmp.ge.s32.totalorder %s38_s23, 2 }
  0x10   : > { %p54_p1 = scmp.ne.s32.totalorder %s1235_s17, %s1231_s16  ;;  %p55_p2 = scmp.eq.s32.totalorder %s1247_s20, 0 }
  0x11   : > { %p60_p3 = scmp.ne.s32.totalorder %s1231_s16, %s1227_s15  ;;  %s1788_s23 = smov (%p40_p0, %s38_s23), 0 }
  0x12   : > { %1768 = sst [smem:[#allocation16_spill]] %s1788_s23  ;;  %p1322_p4 = por %p55_p2, %p54_p1 }
  0x13   : > { %p61_p5 = scmp.eq.s32.totalorder %s1310_s21, 0  ;;  %s42_s26 = ssub.s32 %s1243_s19, %s1788_s23 }
  0x14   : > { %p168_p6 = scmp.eq.s32.totalorder %s1310_s21, 1  ;;  %p45_p7 = scmp.eq.s32.totalorder %s42_s26, 0 }
  0x15   : > { %p1330_p8 = por %p61_p5, %p60_p3  ;;  %p174_p10 = scmp.eq.s32.totalorder %s880_s22, 1 }
  0x16   : > { %p1334_p9 = por %p168_p6, %p54_p1  ;;  %p882_p12 = scmp.ge.s32.totalorder %s1247_s20, 2 }
  0x17   : > { %s1339_s29 = scalar_select %p45_p7, %s1235_s17, %s47_s24  }
  0x18   : > { %p1341_p11 = por %p174_p10, %p60_p3  ;;  %p982_p13 = scmp.lt.s32.totalorder %s1247_s20, 2 }
  0x19   : > { %1772 = sst [smem:[#allocation17_spill]] %s1339_s29  ;;  %s1348_s5 = sand.u32 1, %s1235_s17  }
  0x1a   : > { %s1773_s30 = scalar_select %p1341_p11, 1, 0 }
  0x1b   : > { %s883_s6 = sshll.u32 %s1348_s5, 6  ;;  %s884_s7 = smul.u32 192, %s1243_s19 }
  0x1c   : > { %1774 = sst [smem:[#allocation18_spill]] %s1773_s30  ;;  %p1354_p0 = pnand %p982_p13, %p1322_p4 }
  0x1d   : > { %s219_s9 = sand.u32 1, %s1247_s20   ;;  %s1776_s1 = sld [smem:[#allocation20_spill]] }
  0x1e   : > { %s223_s14 = scalar_lea.vmem [#allocation5], %s883_s6  ;;  %p893_p1 = scmp.ge.s32.totalorder %s1247_s20, 1 }
  0x1f   : > { %s234_s22 = sshll.u32 %s223_s14, 4  ;;  %s220_s25 = scalar_lea.sflag [#allocation6], %s219_s9  ;;  %s235_s22 = int_to_ptr.vmem [resolvable:$true] %s234_s22 }
  0x20   : > { %s1249_s26 = smov 128   ;;  %s1250_s23 = smov 8  }
  0x21   : > { %p290_p2 = scmp.lt.s32.totalorder %s1247_s20, 3  ;;  %s1778_s0 = sld [smem:[#allocation19_spill]] }
  0x22   : > { %s198_s14 = scalar_lea.vmem [#allocation2], %s883_s6  ;;  %s887_s17 = sshll.u32 %s1348_s5, 4 }
  0x23   : > { %s767_s12 = scalar_lea.hbm %s1776_s1, %s884_s7  ;;  %p1369_p3 = pnand %p893_p1, %p290_p2 }
  0x24   : > { %s768_s13 = scalar_lea.hbm %s767_s12, 128  ;;  %s209_s9 = sshll.u32 %s198_s14, 4  ;;  %s210_s9 = int_to_ptr.vmem [resolvable:$true] %s209_s9 }
  0x25   : > { %s232_s24 = sshll.u32 %s768_s13, 4  ;;  %s195_s30 = scalar_lea.sflag [#allocation3], %s1348_s5  ;;  %s233_s24 = int_to_ptr.hbm [resolvable:$true] %s232_s24 }
  0x26   : > { %971 = dma.hbm_to_vmem [thread:$0]  (!%p1354_p0), %s233_s24, 1024, %s235_s22, %s220_s25, %s1249_s26, %s1249_s26, %s1250_s23  }
  0x27   : > { %s758_s13 = scalar_lea.hbm %s1778_s0, %s884_s7  ;;  %s951_s22 = sshll.u32 %s1243_s19, 4 }
  0x28   : > { %s759_s1 = scalar_lea.hbm %s758_s13, 64  ;;  %s248_s24 = scalar_lea.vmem [#allocation7], %s887_s17 }
  0x29   : > { %s207_s29 = sshll.u32 %s759_s1, 4  ;;  %s258_s11 = sshll.u32 %s248_s24, 4  ;;  %s208_s29 = int_to_ptr.hbm [resolvable:$true] %s207_s29  ;;  %s259_s11 = int_to_ptr.vmem [resolvable:$true] %s258_s11 }
  0x2a   : > { %968 = dma.hbm_to_vmem [thread:$0]  (!%p1354_p0), %s208_s29, 1024, %s210_s9, %s195_s30, %s1249_s26, %s1249_s26, %s1250_s23  }
  0x2b   : > { %s255_s12 = scalar_lea.hbm %s1759_s2, %s951_s22  ;;  %s279_s29 = scalar_lea.hbm %s1760_s3, %s951_s22 }
  0x2c   : > { %s256_s13 = sshll.u32 %s255_s12, 4  ;;  %s272_s30 = scalar_lea.vmem [#allocation8], %s887_s17  ;;  %s257_s13 = int_to_ptr.hbm [resolvable:$true] %s256_s13 }
  0x2d   : > { %974 = dma.hbm_to_vmem [thread:$0]  (!%p1354_p0), %s257_s13, 256, %s259_s11, %s220_s25, %s1249_s26, %s1249_s26, %s1250_s23  }
  0x2e   : > { %s282_s9 = sshll.u32 %s272_s30, 4  ;;  %s280_s0 = sshll.u32 %s279_s29, 4  ;;  %s283_s9 = int_to_ptr.vmem [resolvable:$true] %s282_s9  ;;  %s281_s0 = int_to_ptr.hbm [resolvable:$true] %s280_s0 }
  0x2f   : > { %s269_s24 = scalar_lea.sflag [#allocation9], %s1348_s5  ;;  %294 = sbr.rel (%p1369_p3) target bundleno = 127 (0x7f), region = 36 }
  0x30   : > { %977 = dma.hbm_to_vmem [thread:$0]  (!%p1354_p0), %s281_s0, 256, %s283_s9, %s269_s24, %s1249_s26, %s1249_s26, %s1250_s23  }
  0x31   : > { %s1404_s25 = sand.u32 (!%p1369_p3), 1, %s1231_s16  }
  0x32   : > { %s894_s17 = sshll.u32 (!%p1369_p3), %s1404_s25, 6  ;;  %s297_s22 = scalar_lea.sflag (!%p1369_p3), [#allocation3], %s1404_s25 }
  0x33   : > { %s1408_s11 = scalar_lea.vmem (!%p1369_p3), [#allocation2], %s894_s17 }
  0x34   : > { %1210 = dma.done.wait (%p1330_p8), %s297_s22, 1024  }
  0x35   : > { %1212 = vsyncadd (%p1330_p8), %s297_s22, 4294966272  ;;  %s306_s0 = sand.u32 1, %s1310_s21   ;;  %s1415_s5 = scalar_lea.vmem [#allocation5], %s894_s17 }
  0x36   : > { %s307_s23 = scalar_lea.sflag [#allocation6], %s306_s0 }
  0x37   : > { %1214 = dma.done.wait (%p1330_p8), %s307_s23, 1280  }
  0x38   : > { %1216 = vsyncadd (%p1330_p8), %s307_s23, 4294966016  ;;  %s896_s8 = sshll.u32 %s1404_s25, 4  ;;  %s327_s10 = scalar_lea.sflag [#allocation9], %s1404_s25 }
  0x39   : > { %s320_s26 = scalar_lea.vmem [#allocation7], %s896_s8  ;;  %s1423_s7 = scalar_lea.vmem [#allocation8], %s896_s8 }
  0x3a   : > { %1218 = dma.done.wait (%p1330_p8), %s327_s10, 256  }
  0x3b   : > { %1220 = vsyncadd (%p1330_p8), %s327_s10, 4294967040  ;;  %v425_v0 = vld [vmem:[%s320_s26] sm:$0xff]  ;;  %v926_v1 = vld [vmem:[%s320_s26 + $0x8] sm:$0xff]  ;;  %v1251_v23 = vmov 0.0   ;;  %s953_s21 = smul.u32 104, %s1404_s25  ;;  %s703_s29 = scalar_lea.sflag [#allocation4], %s1404_s25 }
  0x3c   : > { %v426_v2 = vunpack.c.0.s8 %v425_v0  ;;  %v427_v3 = vunpack.c.1.s8 %v425_v0  ;;  %v428_v4 = vunpack.c.2.s8 %v425_v0  ;;  %v429_v5 = vunpack.c.3.s8 %v425_v0  ;;  %v1446_v18 = vld [vmem:[%s1408_s11] sm:$0xff]  ;;  %v1449_v19 = vld [vmem:[%s1408_s11 + $0x8] sm:$0xff]  ;;  %v1452_v20 = vld [vmem:[%s1408_s11 + $0x10] sm:$0xff]  ;;  %s954_s6 = smul.u32 104, %s1239_s18  ;;  %s1177_s22 = scalar_lea.hbm %s1761_s4, 208 }
  0x3d   : > { %v563_v6 = vunpack.c.0.s8 %v926_v1  ;;  %v564_v7 = vunpack.c.1.s8 %v926_v1  ;;  %v565_v8 = vunpack.c.2.s8 %v926_v1  ;;  %v566_v9 = vunpack.c.3.s8 %v926_v1  ;;  %v1459_v22 = vld [vmem:[%s1408_s11 + $0x18] sm:$0xff]  ;;  %v1479_v31 = vld [vmem:[%s1408_s11 + $0x20] sm:$0xff]  ;;  %v1485_v33 = vld [vmem:[%s1408_s11 + $0x28] sm:$0xff]  ;;  %s1550_s27 = scalar_lea.vmem [#allocation10], %s953_s21 }
  0x3e   : > { %v1429_v10 = vcvt.s32.f32 %v426_v2  ;;  %v1431_v11 = vcvt.s32.f32 %v427_v3  ;;  %v1433_v12 = vcvt.s32.f32 %v428_v4  ;;  %v1435_v13 = vcvt.s32.f32 %v429_v5  ;;  %v1488_v34 = vld [vmem:[%s1408_s11 + $0x30] sm:$0xff]  ;;  %v1501_v39 = vld [vmem:[%s1408_s11 + $0x38] sm:$0xff]  ;;  %s714_s18 = scalar_lea.hbm %s1761_s4, %s954_s6  ;;  %s715_s1 = sshll.u32 %s1550_s27, 4  ;;  %s716_s1 = int_to_ptr.vmem [resolvable:$true] %s715_s1 }
  0x3f   : > { %v1437_v14 = vcvt.s32.f32 %v563_v6  ;;  %v1439_v15 = vcvt.s32.f32 %v564_v7  ;;  %v1441_v16 = vcvt.s32.f32 %v565_v8  ;;  %v1443_v17 = vcvt.s32.f32 %v566_v9  ;;  %v434_v38 = vld [vmem:[%s1423_s7] sm:$0xff]  ;;  %v927_v1 = vld [vmem:[%s1423_s7 + $0x8] sm:$0xff]  ;;  %s717_s14 = sshll.u32 %s714_s18, 4  ;;  %s718_s14 = int_to_ptr.hbm [resolvable:$true] %s717_s14 }
  0x40   : > { %v449_v21 = vmax.f32 %v1429_v10, 0.0  ;;  %vm443_vm0 = vcmp.eq.f32.partialorder %v1429_v10, 1.0  ;;  %vm470_vm1 = vcmp.eq.f32.partialorder %v1431_v11, 1.0  ;;  %vm497_vm2 = vcmp.eq.f32.partialorder %v1433_v12, 1.0  ;;  %s1171_s30 = sshra.s32 %s718_s14, 4  ;;  %s1172_s30 = int_to_ptr.hbm [resolvable:$true] %s1171_s30 }
  0x41   : > { %v1462_v24 = vsel %vm443_vm0, 1.0, %v1251_v23  ;;  %v1465_v25 = vsel %vm470_vm1, 1.0, %v1251_v23  ;;  %v1468_v26 = vsel %vm497_vm2, 1.0, %v1251_v23  ;;  %vm524_vm3 = vcmp.eq.f32.partialorder %v1435_v13, 1.0  ;;  %s1173_s9 = scalar_lea.hbm %s1172_s30, 104  ;;  %p1178_p7 = scmp.lt.s32.totalorder %s1172_s30, %s1761_s4 }
  0x42   : > { %v476_v27 = vmax.f32 %v449_v21, %v1431_v11  ;;  %v450_v28 = vmul.f32 %v1462_v24, %v1446_v18  ;;  %v477_v29 = vmul.f32 %v1465_v25, %v1449_v19  ;;  %v504_v30 = vmul.f32 %v1468_v26, %v1452_v20  ;;  %p1174_p4 = scmp.ne.s32.totalorder %s1172_s30, %s1173_s9  ;;  %p1179_p8 = scmp.lt.s32.totalorder %s1177_s22, %s1173_s9 }
  0x43   : > { %v1482_v32 = vsel %vm524_vm3, 1.0, %v1251_v23  ;;  %vm581_vm4 = vcmp.eq.f32.partialorder %v1437_v14, 1.0  ;;  %vm608_vm5 = vcmp.eq.f32.partialorder %v1439_v15, 1.0  ;;  %vm635_vm6 = vcmp.eq.f32.partialorder %v1441_v16, 1.0 }
  0x44   : > { %v503_v35 = vmax.f32 %v476_v27, %v1433_v12  ;;  %v531_v36 = vmul.f32 %v1482_v32, %v1459_v22  ;;  %v1497_v37 = vsel %vm581_vm4, 1.0, %v1251_v23  ;;  %v1506_v41 = vsel %vm608_vm5, 1.0, %v1251_v23  ;;  %p1175_p5 = pnand %p1174_p4, %p1334_p9  ;;  %p1180_p10 = por %p1179_p8, %p1178_p7 }
  0x45   : > { %v588_v40 = vmul.f32 %v1497_v37, %v1479_v31  ;;  %v1509_v42 = vsel %vm635_vm6, 1.0, %v1251_v23  ;;  %vm662_vm7 = vcmp.eq.f32.partialorder %v1443_v17, 1.0  ;;  %v479_v44 = vadd.f32 %v477_v29, %v450_v28 }
  0x46   : > { %v530_v43 = vmax.f32 %v503_v35, %v1435_v13  ;;  %v615_v45 = vmul.f32 %v1506_v41, %v1485_v33  ;;  %v642_v46 = vmul.f32 %v1509_v42, %v1488_v34  ;;  %v1518_v47 = vsel %vm662_vm7, 1.0, %v1251_v23  ;;  %p1176_p6 = pneg %p1175_p5 }
  0x47   : > { %v435_v48 = vunpack.c.0.s8 %v434_v38  ;;  %v506_v50 = vadd.f32 %v504_v30, %v479_v44  ;;  %v669_v51 = vmul.f32 %v1518_v47, %v1501_v39  ;;  %v436_v52 = vunpack.c.1.s8 %v434_v38 }
  0x48   : > { %v587_v49 = vmax.f32 %v530_v43, %v1437_v14  ;;  %v480_v53 = vadd.f32 %v1449_v19, %v1446_v18  ;;  %v481_v54 = vadd.f32 %v1465_v25, %v1462_v24  ;;  %v437_v55 = vunpack.c.2.s8 %v434_v38  ;;  %p1181_p13 = pnand %p1180_p10, %p1176_p6 }
  0x49   : > { %v438_v56 = vunpack.c.3.s8 %v434_v38  ;;  %v533_v58 = vadd.f32 %v531_v36, %v506_v50  ;;  %v1529_v59 = vcvt.s32.f32 %v435_v48  ;;  %v1531_v60 = vcvt.s32.f32 %v436_v52 }
  0x4a   : > { %v614_v57 = vmax.f32 %v587_v49, %v1439_v15  ;;  %v507_v61 = vadd.f32 %v480_v53, %v1452_v20  ;;  %v508_v62 = vadd.f32 %v1468_v26, %v481_v54  ;;  %v1535_v63 = vcvt.s32.f32 %v437_v55 }
  0x4b   : > { %v1537_v0 = vcvt.s32.f32 %v438_v56  ;;  %v590_v3 = vadd.f32 %v588_v40, %v533_v58  ;;  %v455_v4 = vmul.f32 %v450_v28, %v1529_v59  ;;  %v482_v5 = vmul.f32 %v477_v29, %v1531_v60 }
  0x4c   : > { %v641_v2 = vmax.f32 %v614_v57, %v1441_v16  ;;  %v534_v6 = vadd.f32 %v507_v61, %v1459_v22  ;;  %v535_v7 = vadd.f32 %v1482_v32, %v508_v62  ;;  %v509_v8 = vmul.f32 %v504_v30, %v1535_v63 }
  0x4d   : > { %v536_v9 = vmul.f32 %v531_v36, %v1537_v0  ;;  %v617_v27 = vadd.f32 %v615_v45, %v590_v3  ;;  %v573_v35 = vunpack.c.0.s8 %v927_v1  ;;  %v574_v44 = vunpack.c.1.s8 %v927_v1 }
  0x4e   : > { %v668_v21 = vmax.f32 %v641_v2, %v1443_v17  ;;  %v591_v38 = vadd.f32 %v1479_v31, %v534_v6  ;;  %v592_v43 = vadd.f32 %v1497_v37, %v535_v7  ;;  %v575_v28 = vunpack.c.2.s8 %v927_v1 }
  0x4f   : > { %v644_v29 = vadd.f32 %v642_v46, %v617_v27  ;;  %v483_v48 = vadd.f32 %v482_v5, %v455_v4  ;;  %v576_v30 = vunpack.c.3.s8 %v927_v1  ;;  %v1553_v49 = vcvt.s32.f32 %v573_v35  ;;  %v1599_v27 = vld [vmem:[%s1415_s5] sm:$0xff] }
  0x50   : > { %689 = vst [vmem:[%s1550_s27] sm:$0xff] %v668_v21  ;;  %v618_v36 = vadd.f32 %v1485_v33, %v591_v38  ;;  %v619_v50 = vadd.f32 %v1506_v41, %v592_v43  ;;  %v1557_v52 = vcvt.s32.f32 %v574_v44  ;;  %v1559_v53 = vcvt.s32.f32 %v575_v28  ;;  %v423_v28 = vld [vmem:[%s1415_s5 + $0x10] sm:$0xff] }
  0x51   : > { %v671_v54 = vadd.f32 %v669_v51, %v644_v29  ;;  %v510_v55 = vadd.f32 %v509_v8, %v483_v48  ;;  %v1561_v56 = vcvt.s32.f32 %v576_v30  ;;  %v593_v57 = vmul.f32 %v588_v40, %v1553_v49 }
  0x52   : > { %v645_v58 = vadd.f32 %v1488_v34, %v618_v36  ;;  %v646_v61 = vadd.f32 %v1509_v42, %v619_v50  ;;  %v620_v1 = vmul.f32 %v615_v45, %v1557_v52  ;;  %v457_v2 = vmul.f32 %v1529_v59, %v1446_v18 }
  0x53   : > { %936 = vst [vmem:[%s1550_s27 + $0x8] sm:$0xff] %v671_v54  ;;  %v537_v62 = vadd.f32 %v536_v9, %v510_v55  ;;  %v484_v3 = vmul.f32 %v1531_v60, %v1449_v19  ;;  %v647_v40 = vmul.f32 %v642_v46, %v1559_v53  ;;  %v674_v7 = vmul.f32 %v669_v51, %v1561_v56  ;;  %v922_v55 = vld [vmem:[%s1415_s5 + $0x20] sm:$0xff] }
  0x54   : > { %v672_v4 = vadd.f32 %v1501_v39, %v645_v58  ;;  %v673_v5 = vadd.f32 %v1518_v47, %v646_v61  ;;  %v511_v8 = vmul.f32 %v1535_v63, %v1452_v20  ;;  %v538_v18 = vmul.f32 %v1537_v0, %v1459_v22 }
  0x55   : > { %v594_v6 = vadd.f32 %v593_v57, %v537_v62  ;;  %v595_v19 = vmul.f32 %v1479_v31, %v1553_v49  ;;  %v459_v45 = vmul.f32 %v1462_v24, %v1529_v59  ;;  %v486_v46 = vmul.f32 %v1465_v25, %v1531_v60 }
  0x56   : > { %937 = vst [vmem:[%s1550_s27 + $0x10] sm:$0xff] %v672_v4  ;;  %v485_v51 = vadd.f32 %v484_v3, %v457_v2  ;;  %v622_v20 = vmul.f32 %v1485_v33, %v1557_v52  ;;  %v649_v21 = vmul.f32 %v1488_v34, %v1559_v53  ;;  %v676_v22 = vmul.f32 %v1501_v39, %v1561_v56  ;;  %v1605_v39 = vld [vmem:[%s1415_s5 + $0x8] sm:$0xff] }
  0x57   : > { %938 = vst [vmem:[%s1550_s27 + $0x18] sm:$0xff] %v673_v5  ;;  %v621_v9 = vadd.f32 %v620_v1, %v594_v6  ;;  %v513_v31 = vmul.f32 %v1468_v26, %v1535_v63  ;;  %v540_v24 = vmul.f32 %v1482_v32, %v1537_v0  ;;  %v597_v33 = vmul.f32 %v1497_v37, %v1553_v49  ;;  %v923_v2 = vld [vmem:[%s1415_s5 + $0x28] sm:$0xff]  ;;  %v924_v6 = vld [vmem:[%s1415_s5 + $0x30] sm:$0xff] }
  0x58   : > { %v512_v35 = vadd.f32 %v511_v8, %v485_v51  ;;  %vm446_vm8 = vcmp.eq.f32.partialorder %v1429_v10, 2.0  ;;  %v487_v34 = vadd.f32 %v486_v46, %v459_v45  ;;  %vm473_vm9 = vcmp.eq.f32.partialorder %v1431_v11, 2.0 }
  0x59   : > { %v648_v25 = vadd.f32 %v647_v40, %v621_v9  ;;  %v1608_v26 = vsel %vm446_vm8, 1.0, %v1251_v23  ;;  %vm500_vm10 = vcmp.eq.f32.partialorder %v1433_v12, 2.0  ;;  %v1615_v37 = vsel %vm473_vm9, 1.0, %v1251_v23  ;;  %v424_v12 = vld [vmem:[%s1415_s5 + $0x18] sm:$0xff] }
  0x5a   : > { %v539_v38 = vadd.f32 %v538_v18, %v512_v35  ;;  %v451_v43 = vmul.f32 %v1608_v26, %v1599_v27  ;;  %v514_v10 = vadd.f32 %v513_v31, %v487_v34  ;;  %v624_v44 = vmul.f32 %v1506_v41, %v1557_v52 }
  0x5b   : > { %v675_v32 = vadd.f32 %v674_v7, %v648_v25  ;;  %v1621_v29 = vsel %vm500_vm10, 1.0, %v1251_v23  ;;  %vm527_vm11 = vcmp.eq.f32.partialorder %v1435_v13, 2.0  ;;  %v478_v48 = vmul.f32 %v1615_v37, %v1605_v39  ;;  %v1658_v7 = vld [vmem:[%s1415_s5 + $0x38] sm:$0xff] }
  0x5c   : > { %v596_v11 = vadd.f32 %v595_v19, %v539_v38  ;;  %v1629_v30 = vsel %vm527_vm11, 1.0, %v1251_v23  ;;  %v541_v36 = vadd.f32 %v540_v24, %v514_v10  ;;  %v651_v41 = vmul.f32 %v1509_v42, %v1559_v53 }
  0x5d   : > { %939 = vst [vmem:[%s1550_s27 + $0x20] sm:$0xff] %v675_v32  ;;  %vm584_vm12 = vcmp.eq.f32.partialorder %v1437_v14, 2.0  ;;  %vm611_vm13 = vcmp.eq.f32.partialorder %v1439_v15, 2.0  ;;  %v488_v13 = vadd.f32 %v478_v48, %v451_v43  ;;  %v505_v54 = vmul.f32 %v1621_v29, %v423_v28 }
  0x5e   : > { %v623_v50 = vadd.f32 %v622_v20, %v596_v11  ;;  %v1638_v57 = vsel %vm584_vm12, 1.0, %v1251_v23  ;;  %v598_v58 = vadd.f32 %v597_v33, %v541_v36  ;;  %v678_v61 = vmul.f32 %v1518_v47, %v1561_v56 }
  0x5f   : > { %v532_v42 = vmul.f32 %v1629_v30, %v424_v12  ;;  %vm638_vm14 = vcmp.eq.f32.partialorder %v1441_v16, 2.0  ;;  %v515_v15 = vadd.f32 %v505_v54, %v488_v13  ;;  %v1645_v62 = vsel %vm611_vm13, 1.0, %v1251_v23 }
  0x60   : > { %v650_v14 = vadd.f32 %v649_v21, %v623_v50  ;;  %vm665_vm15 = vcmp.eq.f32.partialorder %v1443_v17, 2.0  ;;  %v625_v1 = vadd.f32 %v624_v44, %v598_v58  ;;  %v589_v3 = vmul.f32 %v1638_v57, %v922_v55 }
  0x61   : > { %v1651_v4 = vsel %vm638_vm14, 1.0, %v1251_v23  ;;  %v542_v5 = vadd.f32 %v532_v42, %v515_v15  ;;  %v1654_v40 = vsel %vm665_vm15, 1.0, %v1251_v23  ;;  %v489_v17 = vadd.f32 %v1605_v39, %v1599_v27 }
  0x62   : > { %v677_v47 = vadd.f32 %v676_v22, %v650_v14  ;;  %v652_v16 = vadd.f32 %v651_v41, %v625_v1  ;;  %v464_v8 = vmul.f32 %v451_v43, %v1529_v59  ;;  %v491_v18 = vmul.f32 %v478_v48, %v1531_v60 }
  0x63   : > { %v599_v19 = vadd.f32 %v589_v3, %v542_v5  ;;  %v616_v45 = vmul.f32 %v1645_v62, %v923_v2  ;;  %v490_v23 = vadd.f32 %v1615_v37, %v1608_v26  ;;  %v516_v9 = vadd.f32 %v489_v17, %v423_v28 }
  0x64   : > { %940 = vst [vmem:[%s1550_s27 + $0x28] sm:$0xff] %v677_v47  ;;  %v679_v46 = vadd.f32 %v678_v61, %v652_v16  ;;  %v518_v51 = vmul.f32 %v505_v54, %v1535_v63  ;;  %v643_v21 = vmul.f32 %v1651_v4, %v924_v6  ;;  %v670_v22 = vmul.f32 %v1654_v40, %v1658_v7 }
  0x65   : > { %v626_v20 = vadd.f32 %v616_v45, %v599_v19  ;;  %v517_v31 = vadd.f32 %v1621_v29, %v490_v23  ;;  %v543_v24 = vadd.f32 %v516_v9, %v424_v12  ;;  %v492_v25 = vadd.f32 %v491_v18, %v464_v8 }
  0x66   : > { %941 = vst [vmem:[%s1550_s27 + $0x30] sm:$0xff] %v679_v46  ;;  %v545_v35 = vmul.f32 %v532_v42, %v1537_v0  ;;  %v466_v33 = vmul.f32 %v1529_v59, %v1599_v27  ;;  %v602_v38 = vmul.f32 %v589_v3, %v1553_v49  ;;  %v493_v43 = vmul.f32 %v1531_v60, %v1605_v39 }
  0x67   : > { %v653_v34 = vadd.f32 %v643_v21, %v626_v20  ;;  %v544_v32 = vadd.f32 %v1629_v30, %v517_v31  ;;  %v600_v10 = vadd.f32 %v922_v55, %v543_v24  ;;  %v519_v44 = vadd.f32 %v518_v51, %v492_v25 }
  0x68   : > { %v520_v11 = vmul.f32 %v1535_v63, %v423_v28  ;;  %v629_v41 = vmul.f32 %v616_v45, %v1557_v52  ;;  %v494_v27 = vadd.f32 %v493_v43, %v466_v33  ;;  %v547_v54 = vmul.f32 %v1537_v0, %v424_v12 }
  0x69   : > { %v680_v48 = vadd.f32 %v670_v22, %v653_v34  ;;  %v601_v36 = vadd.f32 %v1638_v57, %v544_v32  ;;  %v627_v50 = vadd.f32 %v923_v2, %v600_v10  ;;  %v546_v13 = vadd.f32 %v545_v35, %v519_v44 }
  0x6a   : > { %v656_v61 = vmul.f32 %v643_v21, %v1559_v53  ;;  %v468_v39 = vmul.f32 %v1608_v26, %v1529_v59  ;;  %v495_v28 = vmul.f32 %v1615_v37, %v1531_v60  ;;  %v521_v15 = vadd.f32 %v520_v11, %v494_v27 }
  0x6b   : > { %942 = vst [vmem:[%s1550_s27 + $0x38] sm:$0xff] %v680_v48  ;;  %v628_v58 = vadd.f32 %v1645_v62, %v601_v36  ;;  %v654_v42 = vadd.f32 %v924_v6, %v627_v50  ;;  %v603_v14 = vadd.f32 %v602_v38, %v546_v13  ;;  %v604_v1 = vmul.f32 %v922_v55, %v1553_v49 }
  0x6c   : > { %v683_v3 = vmul.f32 %v670_v22, %v1561_v56  ;;  %v522_v47 = vmul.f32 %v1621_v29, %v1535_v63  ;;  %v548_v5 = vadd.f32 %v547_v54, %v521_v15  ;;  %v631_v60 = vmul.f32 %v923_v2, %v1557_v52 }
  0x6d   : > { %v655_v12 = vadd.f32 %v1651_v4, %v628_v58  ;;  %v681_v59 = vadd.f32 %v1658_v7, %v654_v42  ;;  %v630_v26 = vadd.f32 %v629_v41, %v603_v14  ;;  %v496_v16 = vadd.f32 %v495_v28, %v468_v39 }
  0x6e   : > { %v549_v55 = vmul.f32 %v1629_v30, %v1537_v0  ;;  %v605_v8 = vadd.f32 %v604_v1, %v548_v5  ;;  %v658_v18 = vmul.f32 %v924_v6, %v1559_v53  ;;  %v606_v29 = vmul.f32 %v1638_v57, %v1553_v49 }
  0x6f   : > { %v682_v37 = vadd.f32 %v1654_v40, %v655_v12  ;;  %943 = vst [vmem:[%s1550_s27 + $0x40] sm:$0xff] %v681_v59  ;;  %v657_v17 = vadd.f32 %v656_v61, %v630_v26  ;;  %v523_v63 = vadd.f32 %v522_v47, %v496_v16  ;;  %v685_v45 = vmul.f32 %v1658_v7, %v1561_v56 }
  0x70   : > { %v632_v19 = vadd.f32 %v631_v60, %v605_v8  ;;  %v633_v0 = vmul.f32 %v1645_v62, %v1557_v52  ;;  %v660_v46 = vmul.f32 %v1651_v4, %v1559_v53  ;;  %v687_v7 = vmul.f32 %v1654_v40, %v1561_v56 }
  0x71   : > { %944 = vst [vmem:[%s1550_s27 + $0x48] sm:$0xff] %v682_v37  ;;  %v684_v2 = vadd.f32 %v683_v3, %v657_v17  ;;  %v550_v23 = vadd.f32 %v549_v55, %v523_v63 }
  0x72   : > { %v659_v30 = vadd.f32 %v658_v18, %v632_v19 }
  0x73   : > { %945 = vst [vmem:[%s1550_s27 + $0x50] sm:$0xff] %v684_v2  ;;  %v607_v6 = vadd.f32 %v606_v29, %v550_v23 }
  0x74   : > { %v686_v49 = vadd.f32 %v685_v45, %v659_v30 }
  0x75   : > { %v634_v57 = vadd.f32 %v633_v0, %v607_v6 }
  0x76   : > { %946 = vst [vmem:[%s1550_s27 + $0x58] sm:$0xff] %v686_v49 }
  0x77   : > { %v661_v52 = vadd.f32 %v660_v46, %v634_v57 }
  0x79   : > { %v688_v62 = vadd.f32 %v687_v7, %v661_v52 }
  0x7b   : > { %947 = vst [vmem:[%s1550_s27 + $0x60] sm:$0xff] %v688_v62 }
  0x7c   : > { %1184 = shalt.err (!%p1181_p13)
}
  0x7d   : > { %s1252_s25 = smov 128   ;;  %s1253_s23 = smov 8  }
  0x7e   : > { %963 = dma.vmem_to_hbm [thread:$0]  (%p1334_p9), %s716_s1, 1664, %s718_s14, %s703_s29, %s1252_s25, %s1252_s25, %s1253_s23  }
  0x7f PF: > { %s732_s8 = sand.u32 1, %s1227_s15   ;;  %p979_p0 = pnand %p882_p12, %p1341_p11 }
  0x80   : > { %s733_s26 = scalar_lea.sflag [#allocation4], %s732_s8 }
  0x81   : > { %p980_p1 = pneg %p979_p0 }
  0x83   : > { %1222 = dma.done.wait (%p980_p1), %s733_s26, 1664  }
  0x84   : > { %1224 = vsyncadd (%p980_p1), %s733_s26, 4294965632  ;;  %s26_s20 = sadd.s32 1, %s1247_s20   ;;  %s1780_s10 = sld [smem:[#allocation15_spill]] }
  0x85   : > { %p23_p2 = scmp.ge.s32.totalorder %s26_s20, 4   ;;  %s1781_s17 = sld [smem:[#allocation17_spill]] }
  0x86   : > { %s1782_s28 = sld [smem:[#allocation16_spill]]  ;;  %s1783_s15 = smov %s1231_s16 }
  0x87   : > { %s1785_s18 = smov %s1243_s19 }
  0x88   :  { %25 = sbr.rel (!%p23_p2) target bundleno = 13 (0xd), region = 138 }
  0x8a   : > { %s1784_s16 = smov %s1780_s10 }
  0x8c   : > { %s1786_s19 = smov %s1782_s28 }
  0x8d   :  { %739 = vsyncpa [#allocation3], 1 }
  0x8e   :  { %741 = vsyncpa [#allocation3 + $0x1], 1 }
  0x8f   :  { %742 = vsyncpa [#allocation6], 1 }
  0x90   :  { %744 = vsyncpa [#allocation6 + $0x1], 1 }
  0x91   :  { %745 = vsyncpa [#allocation9], 1 }
  0x92   :  { %747 = vsyncpa [#allocation9 + $0x1], 1 }
  0x93   :  { %748 = vsyncpa [#allocation4], 1 }
  0x94   :  { %750 = vsyncpa [#allocation4 + $0x1], 1 }

</bundles_post_ra>
